<compile_context>
chip_gen: v7x
topology: tpu7x:2x2x1
jax: 0.10.0
libtpu: 0.0.40
codegen_flags: <defaults>
</compile_context>

<pallas_src>
import jax
import jax.numpy as jnp
from jax.experimental import pallas as pl
from jax.experimental.pallas import tpu as pltpu

BN_EPS = 1e-5


# ----------------------------------------------------------------------------
# Kernel
# ----------------------------------------------------------------------------
def group_depth_conv_kernel(
    x_ref,      # [TN, C, HW]  input tile (native NCHW-flattened layout)
    wdw_ref,    # [C, HW]      depthwise weight with BN1 scale folded in
    b1_ref,     # [1, C]       folded BN1 bias
    alpha_ref,  # [1, C]       PReLU per-channel slope
    wlin_ref,   # [C, E]       1x1 conv weight with BN2 scale folded in
    b2_ref,     # [1, E]       folded BN2 bias
    out_ref,    # [TN, E]
):
    x = x_ref[...]                                   # [TN, C, HW]
    wdw = wdw_ref[...]                               # [C, HW]

    # (1) depthwise "global" conv: per-channel weighted sum over the spatial
    #     (lane) axis.  The f32 widen fuses into the reduction accumulator;
    #     no full-size f32 intermediate is materialized.
    s = jnp.sum(x * wdw[None, :, :], axis=-1, dtype=jnp.float32)   # [TN, C]

    # (2) folded BN1 bias + per-channel PReLU.
    y = s + b1_ref[...]
    y = jnp.where(y > 0.0, y, alpha_ref[...] * y)

    # (3) 1x1 conv == dense matmul on the MXU, f32 accumulation.
    wlin = wlin_ref[...]
    z = jnp.dot(y.astype(wlin.dtype), wlin, preferred_element_type=jnp.float32)

    # (4) folded BN2 bias (linear block, no activation).
    out_ref[...] = (z + b2_ref[...]).astype(out_ref.dtype)


# ----------------------------------------------------------------------------
# Parameter preparation (BN folding) — done once, outside the per-call path.
# ----------------------------------------------------------------------------
def prepare_params(params, H, W, io_dtype=jnp.float32):
    """Fold eval-mode BatchNorms into the conv weights (in f32).

    io_dtype: dtype in which the (large) weights are stored. Use bfloat16 when
    x is already produced/stored in bf16 upstream; keep f32 otherwise (the
    wrapper never inserts an astype pass on x).
    """
    f32 = jnp.float32
    C = params["bn1_gamma"].shape[0]
    E = params["bn2_gamma"].shape[0]
    HW = H * W

    scale1 = params["bn1_gamma"].astype(f32) * jax.lax.rsqrt(
        params["bn1_var"].astype(f32) + BN_EPS)
    b1 = params["bn1_beta"].astype(f32) - params["bn1_mean"].astype(f32) * scale1

    scale2 = params["bn2_gamma"].astype(f32) * jax.lax.rsqrt(
        params["bn2_var"].astype(f32) + BN_EPS)
    b2 = params["bn2_beta"].astype(f32) - params["bn2_mean"].astype(f32) * scale2

    # depthwise [C,1,H,W] -> [C, HW] * scale1 (matches the native x layout)
    wdw = params["w_dw"].astype(f32).reshape(C, HW) * scale1[:, None]
    # 1x1 conv [E,C,1,1] -> [C, E] * scale2
    wlin = params["w_lin"].astype(f32).reshape(E, C).T * scale2[None, :]

    return dict(
        wdw=wdw.astype(io_dtype),
        b1=b1.reshape(1, C),
        alpha=params["prelu_alpha"].astype(f32).reshape(1, C),
        wlin=wlin.astype(io_dtype),
        b2=b2.reshape(1, E),
    )


# ----------------------------------------------------------------------------
# Tiling / VMEM accounting (padded shapes)
# ----------------------------------------------------------------------------
def _round_up(a, b):
    return (a + b - 1) // b * b


def _sublane(itemsize):
    return 16 if itemsize == 2 else 8


def _vmem_budget_bytes():
    """Double-buffered footprint budget, derived from the chip's VMEM size."""
    try:
        cap = int(pltpu.get_tpu_info().vmem_capacity_bytes)
    except Exception:
        cap = 64 * 1024 * 1024          # conservative (v7x-sized) fallback
    if cap <= 64 * 1024 * 1024:
        return 40 * 1024 * 1024         # v7x: leave headroom for Mosaic scratch
    return 96 * 1024 * 1024             # v5e / v6e: 128 MiB physical


def _choose_tile_n(N, C, HW, E, x_isz, w_isz, o_isz, budget_bytes):
    """Pick a batch tile whose *padded* double-buffered footprint fits the budget.

    Ensures >= 2 grid steps (v7x megacore sharding) and aims for >= 4 steps
    (DMA/compute overlap) whenever N is large enough.
    Returns (tile_n, padded_vmem_need_bytes).
    """
    # Resident params (constant index maps); count double-buffered, they are small.
    weights = 2 * (
        _round_up(C, _sublane(w_isz)) * _round_up(HW, 128) * w_isz       # wdw
        + _round_up(C, _sublane(w_isz)) * _round_up(E, 128) * w_isz      # wlin
        + 2 * 8 * _round_up(C, 128) * 4                                  # b1, alpha
        + 8 * _round_up(E, 128) * 4)                                     # b2
    # Per-batch-row padded bytes of the double-buffered x and out tiles.
    per_row = 2 * (
        _round_up(C, _sublane(x_isz)) * _round_up(HW, 128) * x_isz       # x row
        + _round_up(E, 128) * o_isz)                                     # out row

    avail = max(budget_bytes - weights, 8 * per_row)
    tn = max(8, min(1024, (avail // per_row) // 8 * 8))

    if N <= 8:
        tn = N                                      # single full-batch tile
    else:
        steps_target = 4 if N >= 32 else 2          # keep both TCs busy + pipeline
        tn = min(tn, max(8, _round_up(pl.cdiv(N, steps_target), 8)))
        tn = min(tn, _round_up(N, 8))

    need = weights + tn * per_row
    return tn, need


# ----------------------------------------------------------------------------
# Wrapper
# ----------------------------------------------------------------------------
def group_depth_conv(x, prepared):
    """x: [N, C, H, W] (NCHW, as in PyTorch). prepared: output of prepare_params."""
    N, C, H, W = x.shape
    HW = H * W
    E = prepared["wlin"].shape[1]
    x_isz = jnp.dtype(x.dtype).itemsize
    w_isz = jnp.dtype(prepared["wlin"].dtype).itemsize
    o_isz = x_isz

    # Native layout: metadata-only reshape, no transpose / pad / astype passes.
    x3 = x.reshape(N, C, HW)

    budget = _vmem_budget_bytes()
    TN, vmem_need = _choose_tile_n(N, C, HW, E, x_isz, w_isz, o_isz, budget)
    n_tiles = pl.cdiv(N, TN)                      # ragged last tile is masked
    vmem_limit = int(min(budget, max(2 * vmem_need, 32 * 1024 * 1024)))

    out = pl.pallas_call(
        group_depth_conv_kernel,
        out_shape=jax.ShapeDtypeStruct((N, E), x.dtype),
        grid=(n_tiles,),
        in_specs=[
            pl.BlockSpec((TN, C, HW), lambda i: (i, 0, 0)),   # x: tiled over batch
            pl.BlockSpec((C, HW), lambda i: (0, 0)),          # weights / params stay
            pl.BlockSpec((1, C), lambda i: (0, 0)),           # VMEM-resident across
            pl.BlockSpec((1, C), lambda i: (0, 0)),           # the whole grid
            pl.BlockSpec((C, E), lambda i: (0, 0)),
            pl.BlockSpec((1, E), lambda i: (0, 0)),
        ],
        out_specs=pl.BlockSpec((TN, E), lambda i: (i, 0)),
        compiler_params=pltpu.CompilerParams(
            dimension_semantics=("parallel",),
            vmem_limit_bytes=vmem_limit,
        ),
    )(x3, prepared["wdw"], prepared["b1"], prepared["alpha"],
      prepared["wlin"], prepared["b2"])

    # torch.squeeze on [N, E, 1, 1] -> [N, E] (or [E] if N == 1)
    return jnp.squeeze(out)


# ----------------------------------------------------------------------------
# Pure-JAX reference (eval-mode BN) and self-test
# ----------------------------------------------------------------------------
def _reference(x, params):
    N, C, H, W = x.shape
    E = params["w_lin"].shape[0]
    wdw = params["w_dw"].reshape(C, H * W)
    s = jnp.sum(x.reshape(N, C, H * W) * wdw[None, :, :], axis=-1)        # [N, C]
    inv1 = jax.lax.rsqrt(params["bn1_var"] + BN_EPS)
    y = (s - params["bn1_mean"]) * inv1 * params["bn1_gamma"] + params["bn1_beta"]
    y = jnp.where(y > 0.0, y, params["prelu_alpha"] * y)
    wlin = params["w_lin"].reshape(E, C).T
    z = jnp.dot(y, wlin, precision=jax.lax.Precision.HIGHEST)             # [N, E]
    inv2 = jax.lax.rsqrt(params["bn2_var"] + BN_EPS)
    z = (z - params["bn2_mean"]) * inv2 * params["bn2_gamma"] + params["bn2_beta"]
    return jnp.squeeze(z)


if __name__ == "__main__":
    # layer_dict entry, e.g. {"feat": (N, plane, kH, kW)} with kH,kW == spatial size.
    # N=24 exercises multi-step grid + ragged last tile; E small stand-in for 512.
    N, C, H, W = 24, 16, 7, 7
    E = 128

    key = jax.random.PRNGKey(0)
    ks = jax.random.split(key, 7)
    x = jax.random.normal(ks[0], (N, C, H, W), jnp.float32)

    params = dict(
        w_dw=0.1 * jax.random.normal(ks[1], (C, 1, H, W), jnp.float32),
        bn1_gamma=1.0 + 0.1 * jax.random.normal(ks[2], (C,), jnp.float32),
        bn1_beta=0.05 * jax.random.normal(ks[3], (C,), jnp.float32),
        bn1_mean=jnp.zeros((C,), jnp.float32),
        bn1_var=jnp.ones((C,), jnp.float32),
        prelu_alpha=jnp.full((C,), 0.25, jnp.float32),
        w_lin=0.1 * jax.random.normal(ks[4], (E, C, 1, 1), jnp.float32),
        bn2_gamma=1.0 + 0.1 * jax.random.normal(ks[5], (E,), jnp.float32),
        bn2_beta=0.05 * jax.random.normal(ks[6], (E,), jnp.float32),
        bn2_mean=jnp.zeros((E,), jnp.float32),
        bn2_var=jnp.ones((E,), jnp.float32),
    )

    # BN folding / weight layout done once, outside the per-call path.
    # TODO(synk): training-mode BatchNorm (batch statistics + running-stat update)
    # is not implemented; this kernel reproduces eval-mode inference only.
    prepared = prepare_params(params, H, W, io_dtype=jnp.float32)

    fwd = jax.jit(group_depth_conv)
    out = fwd(x, prepared)
    jax.block_until_ready(out)

    ref = _reference(x, params)
    assert out.shape == (N, E), out.shape
    assert jnp.allclose(out, ref, rtol=2e-2, atol=2e-2), float(
        jnp.max(jnp.abs(out - ref)))
    print("KERNEL_OK")
</pallas_src>

<mosaic_0001>
module attributes {stable_mosaic.version = 11 : i64} {
  func.func @group_depth_conv_kernel(%arg0: i32, %arg1: memref<16x16x49xf32, #tpu.memory_space<vmem>>, %arg2: memref<16x49xf32, #tpu.memory_space<vmem>>, %arg3: memref<1x16xf32, #tpu.memory_space<vmem>>, %arg4: memref<1x16xf32, #tpu.memory_space<vmem>>, %arg5: memref<16x128xf32, #tpu.memory_space<vmem>>, %arg6: memref<1x128xf32, #tpu.memory_space<vmem>>, %arg7: memref<16x128xf32, #tpu.memory_space<vmem>>) attributes {dimension_semantics = [#tpu.dimension_semantics<parallel>], iteration_bounds = array<i64: 2>, scalar_prefetch = 0 : i64, scratch_operands = 0 : i64, tpu.core_type = #tpu.core_type<tc>, window_params = [{transform_indices = @transform_0, window_bounds = array<i64: 16, 16, 49>}, {pipeline_mode = #tpu.pipeline_mode<synchronous>, transform_indices = @transform_1, window_bounds = array<i64: 16, 49>}, {pipeline_mode = #tpu.pipeline_mode<synchronous>, transform_indices = @transform_2, window_bounds = array<i64: 1, 16>}, {pipeline_mode = #tpu.pipeline_mode<synchronous>, transform_indices = @transform_3, window_bounds = array<i64: 1, 16>}, {pipeline_mode = #tpu.pipeline_mode<synchronous>, transform_indices = @transform_4, window_bounds = array<i64: 16, 128>}, {pipeline_mode = #tpu.pipeline_mode<synchronous>, transform_indices = @transform_5, window_bounds = array<i64: 1, 128>}, {transform_indices = @transform_6, window_bounds = array<i64: 16, 128>}]} {
    %c0 = arith.constant 0 : index
    %c0_0 = arith.constant 0 : index
    %c0_1 = arith.constant 0 : index
    %0 = vector.load %arg1[%c0, %c0_0, %c0_1] : memref<16x16x49xf32, #tpu.memory_space<vmem>>, vector<16x16x49xf32>
    %c0_2 = arith.constant 0 : index
    %c0_3 = arith.constant 0 : index
    %1 = vector.load %arg2[%c0_2, %c0_3] : memref<16x49xf32, #tpu.memory_space<vmem>>, vector<16x49xf32>
    %2 = vector.shape_cast %1 : vector<16x49xf32> to vector<1x16x49xf32>
    %3 = vector.broadcast %2 : vector<1x16x49xf32> to vector<16x16x49xf32>
    %4 = arith.mulf %0, %3 : vector<16x16x49xf32>
    %cst = arith.constant dense<0.000000e+00> : vector<16x16xf32>
    %5 = vector.multi_reduction <add>, %4, %cst [2] : vector<16x16x49xf32> to vector<16x16xf32>
    %c0_4 = arith.constant 0 : index
    %c0_5 = arith.constant 0 : index
    %6 = vector.load %arg3[%c0_4, %c0_5] : memref<1x16xf32, #tpu.memory_space<vmem>>, vector<1x16xf32>
    %7 = vector.broadcast %6 : vector<1x16xf32> to vector<16x16xf32>
    %8 = arith.addf %5, %7 : vector<16x16xf32>
    %cst_6 = arith.constant 0.000000e+00 : f32
    %9 = vector.broadcast %cst_6 : f32 to vector<16x16xf32>
    %10 = arith.cmpf ogt, %8, %9 : vector<16x16xf32>
    %c0_7 = arith.constant 0 : index
    %c0_8 = arith.constant 0 : index
    %11 = vector.load %arg4[%c0_7, %c0_8] : memref<1x16xf32, #tpu.memory_space<vmem>>, vector<1x16xf32>
    %12 = vector.broadcast %11 : vector<1x16xf32> to vector<16x16xf32>
    %13 = arith.mulf %12, %8 : vector<16x16xf32>
    %14 = arith.select %10, %8, %13 : vector<16x16xi1>, vector<16x16xf32>
    %c0_9 = arith.constant 0 : index
    %c0_10 = arith.constant 0 : index
    %15 = vector.load %arg5[%c0_9, %c0_10] : memref<16x128xf32, #tpu.memory_space<vmem>>, vector<16x128xf32>
    %cst_11 = arith.constant dense<0.000000e+00> : vector<16x128xf32>
    %16 = tpu.matmul %14, %15, %cst_11 {dimension_numbers = #tpu.dot_dimension_numbers<[1], [0], [0], [1], [0, 0, 1, 1], [], []>} : vector<16x16xf32>, vector<16x128xf32>, vector<16x128xf32> -> vector<16x128xf32>
    %c0_12 = arith.constant 0 : index
    %c0_13 = arith.constant 0 : index
    %17 = vector.load %arg6[%c0_12, %c0_13] : memref<1x128xf32, #tpu.memory_space<vmem>>, vector<1x128xf32>
    %18 = vector.broadcast %17 : vector<1x128xf32> to vector<16x128xf32>
    %19 = arith.addf %16, %18 : vector<16x128xf32>
    %c0_14 = arith.constant 0 : index
    %c0_15 = arith.constant 0 : index
    %20 = vector.load %arg7[%c0_14, %c0_15] : memref<16x128xf32, #tpu.memory_space<vmem>>, vector<16x128xf32>
    tpu.vector_store %arg7[%c0_14, %c0_15], %19 {strides = array<i32>} : memref<16x128xf32, #tpu.memory_space<vmem>>, vector<16x128xf32>,
    return
  }
  func.func @transform_0(%arg0: i32) -> (i32, i32, i32) {
    %c0_i32 = arith.constant 0 : i32
    %c0_i32_0 = arith.constant 0 : i32
    %c0_i32_1 = arith.constant 0 : i32
    return %arg0, %c0_i32, %c0_i32_0 : i32, i32, i32
  }
  func.func @transform_1(%arg0: i32) -> (i32, i32) {
    %c0_i32 = arith.constant 0 : i32
    %c0_i32_0 = arith.constant 0 : i32
    %c0_i32_1 = arith.constant 0 : i32
    return %c0_i32, %c0_i32_0 : i32, i32
  }
  func.func @transform_2(%arg0: i32) -> (i32, i32) {
    %c0_i32 = arith.constant 0 : i32
    %c0_i32_0 = arith.constant 0 : i32
    %c0_i32_1 = arith.constant 0 : i32
    return %c0_i32, %c0_i32_0 : i32, i32
  }
  func.func @transform_3(%arg0: i32) -> (i32, i32) {
    %c0_i32 = arith.constant 0 : i32
    %c0_i32_0 = arith.constant 0 : i32
    %c0_i32_1 = arith.constant 0 : i32
    return %c0_i32, %c0_i32_0 : i32, i32
  }
  func.func @transform_4(%arg0: i32) -> (i32, i32) {
    %c0_i32 = arith.constant 0 : i32
    %c0_i32_0 = arith.constant 0 : i32
    %c0_i32_1 = arith.constant 0 : i32
    return %c0_i32, %c0_i32_0 : i32, i32
  }
  func.func @transform_5(%arg0: i32) -> (i32, i32) {
    %c0_i32 = arith.constant 0 : i32
    %c0_i32_0 = arith.constant 0 : i32
    %c0_i32_1 = arith.constant 0 : i32
    return %c0_i32, %c0_i32_0 : i32, i32
  }
  func.func @transform_6(%arg0: i32) -> (i32, i32) {
    %c0_i32 = arith.constant 0 : i32
    %c0_i32_0 = arith.constant 0 : i32
    return %arg0, %c0_i32 : i32, i32
  }
}

</mosaic_0001>

<bundles_post_ra>
// kernel: group_depth_conv.1
= control target key start
LH: loop header
LB: loop body
LE: loop exit
PB: predicated region body
PF: predicated region fallthrough
CT: control target
= control target key end

     0   :  { %11 = vsyncpa [#allocation3], 0  ;;  %s2348_s0 = inlined_call_operand.vmem [shape: f32[24,16,49], index: 0, kind: input, shape index: {}]   ;;  %s2349_s1 = inlined_call_operand.vmem [shape: f32[16,49], index: 1, kind: input, shape index: {}]   ;;  %s2350_s2 = inlined_call_operand.vmem [shape: f32[1,16], index: 2, kind: input, shape index: {}]   ;;  %s2351_s3 = inlined_call_operand.vmem [shape: f32[1,16], index: 3, kind: input, shape index: {}]   ;;  %s2352_s4 = inlined_call_operand.vmem [shape: f32[16,128], index: 4, kind: input, shape index: {}]   ;;  %s2353_s5 = inlined_call_operand.vmem [shape: f32[1,128], index: 5, kind: input, shape index: {}]   ;;  %s2354_s6 = inlined_call_operand.hbm [shape: f32[24,128], index: 6, kind: output, shape index: {}]  }
   0x1   :  { %13 = vsyncpa [#allocation3 + $0x1], 0  ;;  %s1721_s21 = smov 0   ;;  %s1723_s22 = smov 0  }
   0x2   :  { %s1725_s23 = smov 0   ;;  %s1727_s24 = smov 0  }
   0x3 LB: > { %s1742_s25 = sadd.s32 4294967295, %s1680_s24   ;;  %s1536_s26 = sadd.s32 4294967294, %s1680_s24   ;;  %s1680_s24 = sphi %s1727_s24, %s2388_s24   ;;  %s1676_s23 = sphi %s1725_s23, %s2387_s23   ;;  %s1672_s22 = sphi %s1723_s22, %s2386_s22   ;;  %s1668_s21 = sphi %s1721_s21, %s2385_s21  }
   0x4   : > { %s1746_s27 = sadd.s32 1, %s1680_s24   ;;  %s157_s28 = sadd.s32 1, %s1676_s23 }
   0x5   : > { %s154_s29 = ssub.s32 %s1680_s24, %s1746_s27  ;;  %p167_p0 = scmp.ne.s32.totalorder %s1676_s23, %s1672_s22 }
   0x6   : > { %p155_p1 = scmp.eq.s32.totalorder %s154_s29, 0  ;;  %p168_p2 = scmp.eq.s32.totalorder %s1742_s25, 1 }
   0x7   : > { %p173_p3 = scmp.ne.s32.totalorder %s1672_s22, %s1668_s21  ;;  %p174_p4 = scmp.eq.s32.totalorder %s1536_s26, 1 }
   0x8   : > { %s1757_s30 = scalar_select %p155_p1, %s1676_s23, %s157_s28  }
   0x9   : > { %p1759_p5 = por %p168_p2, %p167_p0  ;;  %p1763_p6 = por %p174_p4, %p173_p3 }
   0xa   : > { %p1539_p7 = scmp.ge.s32.totalorder %s1680_s24, 1  ;;  %p227_p8 = scmp.lt.s32.totalorder %s1680_s24, 3 }
   0xc   : > { %p228_p9 = pnand %p1539_p7, %p227_p8 }
   0xe   : > { %231 = sbr.rel (%p228_p9) target bundleno = 983 (0x3d7), region = 44 }
  0x15   : > { %s1541_s9 = sshll.u32 %s1742_s25, 4  ;;  %v1773_v0 = vld [vmem:[%s2349_s1] sm:$0xff]  ;;  %v1778_v1 = vld [vmem:[%s2349_s1 + $0x8] sm:$0xff]  ;;  %vm351_vm0 = vcmask 400384   ;;  %vm673_vm1 = vcmask 130112   ;;  %vm810_vm2 = vcmask 1041409  }
  0x16   : > { %p269_p10 = scmp.lt.s32.totalorder %s1541_s9, 23  ;;  %vm812_vm3 = vcmask 1042434   ;;  %vm814_vm4 = vcmask 1043459   ;;  %vm816_vm5 = vcmask 1044484   ;;  %vm818_vm6 = vcmask 1045509   ;;  %s260_s11 = sand.u32 1, %s1672_s22  }
  0x17   : > { %vm820_vm7 = vcmask 1046534   ;;  %vm822_vm8 = vcmask 1047559   ;;  %s1540_s12 = sshll.u32 %s260_s11, 4  ;;  %s2288_s16 = scalar_lea.sflag [#allocation3], %s260_s11 }
  0x18   : > { %s2390_s9 = smov (!%p269_p10, %s1541_s9), 23  ;;  %s262_s15 = scalar_lea.vmem [#allocation2], %s1540_s12 }
  0x19   : > { %s1558_s10 = sshll.u32 %s2390_s9, 4 }
  0x1a   : > { %s1783_s17 = scalar_lea.vmem %s2348_s0, %s1558_s10 }
  0x1b   : > { %v287_v2 = vld [vmem:[%s1783_s17 + $0x10] sm:$0xff]  ;;  %v285_v3 = vld [vmem:[%s1783_s17] sm:$0xff]  ;;  %v288_v4 = vld [vmem:[%s1783_s17 + $0x18] sm:$0xff] }
  0x1c   : > { %v321_v5 = vmul.f32 %v1773_v0, %v287_v2  ;;  %v319_v6 = vmul.f32 %v1773_v0, %v285_v3  ;;  %v322_v7 = vmul.f32 %v1778_v1, %v288_v4  ;;  %v286_v8 = vld [vmem:[%s1783_s17 + $0x8] sm:$0xff]  ;;  %v289_v11 = vld [vmem:[%s1783_s17 + $0x20] sm:$0xff]  ;;  %v304_v24 = vld [vmem:[%s1783_s17 + $0x98] sm:$0xff] }
  0x1d   : > { %v320_v9 = vmul.f32 %v1778_v1, %v286_v8  ;;  %v290_v10 = vld [vmem:[%s1783_s17 + $0x28] sm:$0xff]  ;;  %v323_v17 = vmul.f32 %v1773_v0, %v289_v11  ;;  %v301_v19 = vld [vmem:[%s1783_s17 + $0x80] sm:$0xff]  ;;  %v303_v25 = vld [vmem:[%s1783_s17 + $0x90] sm:$0xff]  ;;  %v338_v28 = vmul.f32 %v1778_v1, %v304_v24 }
  0x1e   : > { %v358_v12 = vsel %vm351_vm0, %v321_v5, 0.0  ;;  %v352_v13 = vsel %vm351_vm0, %v319_v6, 0.0  ;;  %v361_v14 = vsel %vm351_vm0, %v322_v7, 0.0  ;;  %v324_v16 = vmul.f32 %v1778_v1, %v290_v10  ;;  %v302_v18 = vld [vmem:[%s1783_s17 + $0x88] sm:$0xff]  ;;  %v292_v30 = vld [vmem:[%s1783_s17 + $0x38] sm:$0xff]  ;;  %v291_v31 = vld [vmem:[%s1783_s17 + $0x30] sm:$0xff] }
  0x1f   : > { %359 = vadd.xlane.f32.xlu1 %v358_v12  ;;  %353 = vadd.xlane.f32.xlu0 %v352_v13  ;;  %v355_v15 = vsel %vm351_vm0, %v320_v9, 0.0  ;;  %v364_v21 = vsel %vm351_vm0, %v323_v17, 0.0  ;;  %v336_v22 = vmul.f32 %v1778_v1, %v302_v18  ;;  %v335_v23 = vmul.f32 %v1773_v0, %v301_v19  ;;  %v306_v36 = vld [vmem:[%s1783_s17 + $0xa8] sm:$0xff]  ;;  %v305_v37 = vld [vmem:[%s1783_s17 + $0xa0] sm:$0xff]  ;;  %v308_v48 = vld [vmem:[%s1783_s17 + $0xb8] sm:$0xff] }
  0x20   : > { %v367_v20 = vsel %vm351_vm0, %v324_v16, 0.0  ;;  %v337_v29 = vmul.f32 %v1773_v0, %v303_v25  ;;  %v409_v32 = vsel %vm351_vm0, %v338_v28, 0.0  ;;  %v326_v34 = vmul.f32 %v1778_v1, %v292_v30  ;;  %v294_v42 = vld [vmem:[%s1783_s17 + $0x48] sm:$0xff]  ;;  %v293_v43 = vld [vmem:[%s1783_s17 + $0x40] sm:$0xff]  ;;  %v307_v49 = vld [vmem:[%s1783_s17 + $0xb0] sm:$0xff] }
  0x21   : > { %v403_v26 = vsel %vm351_vm0, %v336_v22, 0.0  ;;  %v400_v27 = vsel %vm351_vm0, %v335_v23, 0.0  ;;  %v325_v35 = vmul.f32 %v1773_v0, %v291_v31  ;;  %v340_v40 = vmul.f32 %v1778_v1, %v306_v36  ;;  %v296_v54 = vld [vmem:[%s1783_s17 + $0x58] sm:$0xff]  ;;  %v295_v55 = vld [vmem:[%s1783_s17 + $0x50] sm:$0xff]  ;;  %v310_v60 = vld [vmem:[%s1783_s17 + $0xc8] sm:$0xff] }
  0x22   : > { %v406_v33 = vsel %vm351_vm0, %v337_v29, 0.0  ;;  %v373_v38 = vsel %vm351_vm0, %v326_v34, 0.0  ;;  %v339_v41 = vmul.f32 %v1773_v0, %v305_v37  ;;  %v328_v46 = vmul.f32 %v1778_v1, %v294_v42  ;;  %v309_v61 = vld [vmem:[%s1783_s17 + $0xc0] sm:$0xff]  ;;  %v298_v4 = vld [vmem:[%s1783_s17 + $0x68] sm:$0xff]  ;;  %v312_v10 = vld [vmem:[%s1783_s17 + $0xd8] sm:$0xff] }
  0x23   : > { %362 = vadd.xlane.f32.xlu1 %v361_v14  ;;  %356 = vadd.xlane.f32.xlu0 %v355_v15  ;;  %v370_v39 = vsel %vm351_vm0, %v325_v35, 0.0  ;;  %v415_v44 = vsel %vm351_vm0, %v340_v40, 0.0  ;;  %v327_v47 = vmul.f32 %v1773_v0, %v293_v43  ;;  %v342_v52 = vmul.f32 %v1778_v1, %v308_v48  ;;  %v297_v5 = vld [vmem:[%s1783_s17 + $0x60] sm:$0xff]  ;;  %v311_v11 = vld [vmem:[%s1783_s17 + $0xd0] sm:$0xff]  ;;  %v300_v16 = vld [vmem:[%s1783_s17 + $0x78] sm:$0xff] }
  0x24   : > { %v412_v45 = vsel %vm351_vm0, %v339_v41, 0.0  ;;  %v379_v50 = vsel %vm351_vm0, %v328_v46, 0.0  ;;  %v341_v53 = vmul.f32 %v1773_v0, %v307_v49  ;;  %v330_v58 = vmul.f32 %v1778_v1, %v296_v54  ;;  %v299_v17 = vld [vmem:[%s1783_s17 + $0x70] sm:$0xff]  ;;  %v314_v22 = vld [vmem:[%s1783_s17 + $0xe8] sm:$0xff]  ;;  %v313_v23 = vld [vmem:[%s1783_s17 + $0xe0] sm:$0xff] }
  0x25   : > { %v376_v51 = vsel %vm351_vm0, %v327_v47, 0.0  ;;  %v421_v56 = vsel %vm351_vm0, %v342_v52, 0.0  ;;  %v329_v59 = vmul.f32 %v1773_v0, %v295_v55  ;;  %v344_v2 = vmul.f32 %v1778_v1, %v310_v60  ;;  %v316_v28 = vld [vmem:[%s1783_s17 + $0xf8] sm:$0xff]  ;;  %v315_v29 = vld [vmem:[%s1783_s17 + $0xf0] sm:$0xff]  ;;  %v1544_v36 = vld [vmem:[%s2350_s2] ss:$0 sm:$0xff] }
  0x26   : > { %v418_v57 = vsel %vm351_vm0, %v341_v53, 0.0  ;;  %v385_v62 = vsel %vm351_vm0, %v330_v58, 0.0  ;;  %v343_v3 = vmul.f32 %v1773_v0, %v309_v61  ;;  %v332_v8 = vmul.f32 %v1778_v1, %v298_v4  ;;  %s1550_s17 = sshll.u32 (%p1759_p5), %s1742_s25, 1 }
  0x27   : > { %368 = vadd.xlane.f32.xlu1 %v367_v20  ;;  %365 = vadd.xlane.f32.xlu0 %v364_v21  ;;  %v382_v63 = vsel %vm351_vm0, %v329_v59, 0.0  ;;  %v427_v6 = vsel %vm351_vm0, %v344_v2, 0.0  ;;  %v331_v9 = vmul.f32 %v1773_v0, %v297_v5  ;;  %v346_v14 = vmul.f32 %v1778_v1, %v312_v10  ;;  %s1463_s18 = ssub.s32 (%p1759_p5), 3, %s1550_s17 }
  0x28   : > { %v424_v7 = vsel %vm351_vm0, %v343_v3, 0.0  ;;  %v391_v12 = vsel %vm351_vm0, %v332_v8, 0.0  ;;  %v345_v15 = vmul.f32 %v1773_v0, %v311_v11  ;;  %v334_v20 = vmul.f32 %v1778_v1, %v300_v16  ;;  %p1464_p11 = scmp.lt.s32.totalorder (%p1759_p5), %s1463_s18, 2 }
  0x29   : > { %v388_v13 = vsel %vm351_vm0, %v331_v9, 0.0  ;;  %v433_v18 = vsel %vm351_vm0, %v346_v14, 0.0  ;;  %v333_v21 = vmul.f32 %v1773_v0, %v299_v17  ;;  %v1682_v37 = vmov 0  }
  0x2a   : > { %v430_v19 = vsel %vm351_vm0, %v345_v15, 0.0  ;;  %v397_v24 = vsel %vm351_vm0, %v334_v20, 0.0  ;;  %1617 = vset.pattern.permute.xlu0 %v1682_v37  ;;  %1616 = vset.pattern.permute.xlu1 %v1682_v37 }
  0x2b   : > { %404 = vadd.xlane.f32.xlu1 %v403_v26  ;;  %401 = vadd.xlane.f32.xlu0 %v400_v27  ;;  %v394_v25 = vsel %vm351_vm0, %v333_v21, 0.0  ;;  %v348_v26 = vmul.f32 %v1778_v1, %v314_v22  ;;  %v347_v27 = vmul.f32 %v1773_v0, %v313_v23 }
  0x2d   : > { %v439_v30 = vsel %vm351_vm0, %v348_v26, 0.0  ;;  %v436_v31 = vsel %vm351_vm0, %v347_v27, 0.0 }
  0x2f   : > { %410 = vadd.xlane.f32.xlu1 %v409_v32  ;;  %407 = vadd.xlane.f32.xlu0 %v406_v33  ;;  %v350_v32 = vmul.f32 %v1778_v1, %v316_v28  ;;  %v349_v33 = vmul.f32 %v1773_v0, %v315_v29 }
  0x31   : > { %v445_v34 = vsel %vm351_vm0, %v350_v32, 0.0  ;;  %v442_v35 = vsel %vm351_vm0, %v349_v33, 0.0 }
  0x33   : > { %374 = vadd.xlane.f32.xlu1 %v373_v38  ;;  %371 = vadd.xlane.f32.xlu0 %v370_v39 }
  0x37   : > { %416 = vadd.xlane.f32.xlu1 %v415_v44  ;;  %413 = vadd.xlane.f32.xlu0 %v412_v45 }
  0x3b   : > { %380 = vadd.xlane.f32.xlu1 %v379_v50  ;;  %377 = vadd.xlane.f32.xlu0 %v376_v51 }
  0x3f   : > { %422 = vadd.xlane.f32.xlu1 %v421_v56  ;;  %419 = vadd.xlane.f32.xlu0 %v418_v57 }
  0x43   : > { %386 = vadd.xlane.f32.xlu1 %v385_v62  ;;  %383 = vadd.xlane.f32.xlu0 %v382_v63 }
  0x47   : > { %428 = vadd.xlane.f32.xlu1 %v427_v6  ;;  %425 = vadd.xlane.f32.xlu0 %v424_v7 }
  0x4b   : > { %392 = vadd.xlane.f32.xlu1 %v391_v12  ;;  %389 = vadd.xlane.f32.xlu0 %v388_v13 }
  0x4f   : > { %434 = vadd.xlane.f32.xlu1 %v433_v18  ;;  %431 = vadd.xlane.f32.xlu0 %v430_v19 }
  0x53   : > { %398 = vadd.xlane.f32.xlu1 %v397_v24  ;;  %395 = vadd.xlane.f32.xlu0 %v394_v25 }
  0x57   : > { %440 = vadd.xlane.f32.xlu1 %v439_v30  ;;  %437 = vadd.xlane.f32.xlu0 %v436_v31 }
  0x5b   : > { %446 = vadd.xlane.f32.xlu1 %v445_v34  ;;  %443 = vadd.xlane.f32.xlu0 %v442_v35 }
  0x6c   : > { %459 = vbcast.lane.b32.xlu1 %v1544_v36, 264 }
  0x71   : > { %455 = vbcast.lane.b32.xlu0 %v1544_v36, 256 }
  0xac   : > { %v360_v1 = vpop.xlane.xlu1 %359  ;;  %v354_v38 = vpop.xlane.xlu0 %353 }
  0xb0   : > { %v363_v0 = vpop.xlane.xlu1 %362  ;;  %v357_v39 = vpop.xlane.xlu0 %356 }
  0xb4   : > { %v369_v40 = vpop.xlane.xlu1 %368  ;;  %v366_v41 = vpop.xlane.xlu0 %365 }
  0xb8   : > { %v405_v42 = vpop.xlane.xlu1 %404  ;;  %v402_v43 = vpop.xlane.xlu0 %401 }
  0xbc   : > { %v411_v44 = vpop.xlane.xlu1 %410  ;;  %v408_v45 = vpop.xlane.xlu0 %407 }
  0xc0   : > { %v375_v46 = vpop.xlane.xlu1 %374  ;;  %v372_v47 = vpop.xlane.xlu0 %371 }
  0xc4   : > { %v417_v48 = vpop.xlane.xlu1 %416  ;;  %v414_v49 = vpop.xlane.xlu0 %413 }
  0xc8   : > { %v381_v50 = vpop.xlane.xlu1 %380  ;;  %v378_v51 = vpop.xlane.xlu0 %377 }
  0xcc   : > { %v423_v52 = vpop.xlane.xlu1 %422  ;;  %v420_v53 = vpop.xlane.xlu0 %419 }
  0xd0   : > { %v387_v54 = vpop.xlane.xlu1 %386  ;;  %v384_v55 = vpop.xlane.xlu0 %383 }
  0xd4   : > { %v429_v56 = vpop.xlane.xlu1 %428  ;;  %v426_v57 = vpop.xlane.xlu0 %425 }
  0xd8   : > { %v393_v58 = vpop.xlane.xlu1 %392  ;;  %v390_v59 = vpop.xlane.xlu0 %389 }
  0xdc   : > { %v435_v60 = vpop.xlane.xlu1 %434  ;;  %v432_v61 = vpop.xlane.xlu0 %431 }
  0xe0   : > { %v399_v62 = vpop.xlane.xlu1 %398  ;;  %v1884_v63 = vpop.xlane.xlu0 %395 }
  0xe4   : > { %v441_v2 = vpop.xlane.xlu1 %440  ;;  %v1886_v3 = vpop.xlane.xlu0 %437 }
  0xe8   : > { %v447_v4 = vpop.xlane.xlu1 %446  ;;  %v1888_v5 = vpop.xlane.xlu0 %443 }
  0xec   : > { %v1890_v6 = vpop.permute.xlu0 %455  ;;  %v460_v9 = vpop.permute.xlu1 %459 }
  0xed   : > { %v1893_v7 = vadd.f32 %v1890_v6, %v360_v1  ;;  %v1896_v8 = vadd.f32 %v1890_v6, %v354_v38  ;;  %v1900_v10 = vadd.f32 %v460_v9, %v369_v40  ;;  %v1902_v11 = vadd.f32 %v460_v9, %v357_v39 }
  0xee   : > { %v1906_v12 = vadd.f32 %v460_v9, %v405_v42  ;;  %v1908_v13 = vadd.f32 %v460_v9, %v363_v0  ;;  %v1912_v14 = vadd.f32 %v460_v9, %v411_v44  ;;  %v1915_v15 = vadd.f32 %v1890_v6, %v366_v41 }
  0xef   : > { %573 = vperm.xlu0 %1617, %v1893_v7   ;;  %567 = vperm.xlu1 %1616, %v1896_v8   ;;  %v1919_v16 = vadd.f32 %v460_v9, %v375_v46  ;;  %v1922_v17 = vadd.f32 %v1890_v6, %v402_v43  ;;  %v1926_v18 = vadd.f32 %v460_v9, %v417_v48  ;;  %vm495_vm9 = vcmp.gt.f32.partialorder %v1896_v8, 0.0 }
  0xf0   : > { %v1929_v19 = vadd.f32 %v1890_v6, %v408_v45  ;;  %v1933_v20 = vadd.f32 %v460_v9, %v381_v50  ;;  %v1936_v21 = vadd.f32 %v1890_v6, %v372_v47  ;;  %v1940_v22 = vadd.f32 %v460_v9, %v423_v52 }
  0xf1   : > { %v1943_v23 = vadd.f32 %v1890_v6, %v414_v49  ;;  %v1947_v24 = vadd.f32 %v460_v9, %v387_v54  ;;  %v1950_v25 = vadd.f32 %v1890_v6, %v378_v51  ;;  %v1954_v26 = vadd.f32 %v460_v9, %v429_v56 }
  0xf2   : > { %v1957_v27 = vadd.f32 %v1890_v6, %v420_v53  ;;  %v1961_v28 = vadd.f32 %v460_v9, %v393_v58  ;;  %v1964_v29 = vadd.f32 %v1890_v6, %v384_v55  ;;  %v1968_v30 = vadd.f32 %v460_v9, %v435_v60 }
  0xf3   : > { %582 = vperm.xlu0 %1617, %v1900_v10   ;;  %570 = vperm.xlu1 %1616, %v1902_v11   ;;  %v1971_v31 = vadd.f32 %v1890_v6, %v426_v57  ;;  %v1975_v32 = vadd.f32 %v460_v9, %v399_v62  ;;  %v1978_v33 = vadd.f32 %v1890_v6, %v390_v59  ;;  %v662_v56 = vlaneseq }
  0xf4   : > { %v1982_v34 = vadd.f32 %v460_v9, %v441_v2  ;;  %v1985_v35 = vadd.f32 %v1890_v6, %v432_v61  ;;  %v1989_v36 = vadd.f32 %v460_v9, %v447_v4  ;;  %v1993_v37 = vadd.f32 %v1890_v6, %v1884_v63 }
  0xf5   : > { %2371 = vst [vmem:[#allocation5_spill] sm:$0xff] %v1975_v32  ;;  %v1999_v1 = vadd.f32 %v1890_v6, %v1886_v3  ;;  %v2004_v38 = vadd.f32 %v1890_v6, %v1888_v5  ;;  %v663_v59 = vand.u32 127, %v662_v56  ;;  %v2025_v62 = vshrl.u32 %v662_v56, 7 }
  0xf6   : > { %2372 = vst [vmem:[#allocation6_spill] sm:$0xff] %v1982_v34  ;;  %2373 = vst [vmem:[#allocation7_spill] sm:$0xff] %v1985_v35  ;;  %vm496_vm10 = vcmp.gt.f32.partialorder %v1902_v11, 0.0  ;;  %vm498_vm11 = vcmp.gt.f32.partialorder %v1908_v13, 0.0  ;;  %vm497_vm12 = vcmp.gt.f32.partialorder %v1893_v7, 0.0  ;;  %vm500_vm13 = vcmp.gt.f32.partialorder %v1900_v10, 0.0 }
  0xf7   : > { %618 = vperm.xlu0 %1617, %v1906_v12   ;;  %576 = vperm.xlu1 %1616, %v1908_v13   ;;  %2374 = vst [vmem:[#allocation8_spill] sm:$0xff] %v1989_v36  ;;  %2375 = vst [vmem:[#allocation9_spill] sm:$0xff] %v1993_v37  ;;  %v668_v63 = vadd.s32 4294967288, %v663_v59  ;;  %v2032_v4 = vsub.s32 %v663_v59, %v2025_v62  ;;  %vm499_vm14 = vcmp.gt.f32.partialorder %v1915_v15, 0.0  ;;  %vm512_vm15 = vcmp.gt.f32.partialorder %v1906_v12, 0.0 }
  0xf8   : > { %2376 = vst [vmem:[#allocation10_spill] sm:$0xff] %v1999_v1  ;;  %2377 = vst [vmem:[#allocation11_spill] sm:$0xff] %v2004_v38  ;;  %vm511_vm0 = vcmp.gt.f32.partialorder %v1922_v17, 0.0 }
  0xf9   : > { %v2035_v5 = vsub.s32 %v668_v63, %v2025_v62 }
  0xfb   : > { %624 = vperm.xlu0 %1617, %v1912_v14   ;;  %579 = vperm.xlu1 %1616, %v1915_v15  }
  0xff   : > { %588 = vperm.xlu0 %1617, %v1919_v16   ;;  %615 = vperm.xlu1 %1616, %v1922_v17  }
 0x103   : > { %630 = vperm.xlu0 %1617, %v1926_v18   ;;  %621 = vperm.xlu1 %1616, %v1929_v19  }
 0x107   : > { %594 = vperm.xlu0 %1617, %v1933_v20   ;;  %585 = vperm.xlu1 %1616, %v1936_v21  }
 0x10b   : > { %636 = vperm.xlu0 %1617, %v1940_v22   ;;  %627 = vperm.xlu1 %1616, %v1943_v23  }
 0x10f   : > { %600 = vperm.xlu0 %1617, %v1947_v24   ;;  %591 = vperm.xlu1 %1616, %v1950_v25  }
 0x113   : > { %642 = vperm.xlu0 %1617, %v1954_v26   ;;  %633 = vperm.xlu1 %1616, %v1957_v27  }
 0x117   : > { %606 = vperm.xlu0 %1617, %v1961_v28   ;;  %597 = vperm.xlu1 %1616, %v1964_v29  }
 0x11b   : > { %648 = vperm.xlu0 %1617, %v1968_v30   ;;  %639 = vperm.xlu1 %1616, %v1971_v31  }
 0x11f   : > { %612 = vperm.xlu0 %1617, %v1975_v32   ;;  %603 = vperm.xlu1 %1616, %v1978_v33  }
 0x123   : > { %654 = vperm.xlu0 %1617, %v1982_v34   ;;  %645 = vperm.xlu1 %1616, %v1985_v35  }
 0x127   : > { %660 = vperm.xlu0 %1617, %v1989_v36   ;;  %609 = vperm.xlu1 %1616, %v1993_v37  }
 0x12b   : > { %651 = vperm.xlu1 %1616, %v1999_v1  }
 0x12f   : > { %657 = vperm.xlu1 %1616, %v2004_v38  }
 0x16e   : > { %v574_v0 = vpop.permute.xlu0 %573  ;;  %v568_v39 = vpop.permute.xlu1 %567 }
 0x16f   : > { %v678_v38 = vrot.slane %v574_v0, %v2032_v4 }
 0x172   : > { %v583_v40 = vpop.permute.xlu0 %582  ;;  %v571_v41 = vpop.permute.xlu1 %570 }
 0x173   : > { %v672_v36 = vrot.slane %v571_v41, %v2035_v5  ;;  %v691_v59 = vrot.slane %v583_v40, %v2035_v5 }
 0x176   : > { %v2007_v42 = vpop.permute.xlu0 %618  ;;  %v577_v43 = vpop.permute.xlu1 %576 }
 0x177   : > { %v682_v6 = vrot.slane %v577_v43, %v2035_v5  ;;  %v667_v43 = vrot.slane %v568_v39, %v2032_v4 }
 0x17a   : > { %v2009_v44 = vpop.permute.xlu0 %624  ;;  %v580_v45 = vpop.permute.xlu1 %579 }
 0x17b   : > { %v687_v9 = vrot.slane %v580_v45, %v2032_v4  ;;  %v683_v45 = vsel %vm673_vm1, %v682_v6, %v678_v38  ;;  %v839_v38 = vsub.s32 0, %v2025_v62 }
 0x17d   : > { %v692_v41 = vsel %vm673_vm1, %v691_v59, %v687_v9  ;;  %v745_v9 = vrot.slane %v2007_v42, %v2035_v5 }
 0x17e   : > { %v589_v46 = vpop.permute.xlu0 %588  ;;  %v2011_v47 = vpop.permute.xlu1 %615 }
 0x17f   : > { %v700_v37 = vrot.slane %v589_v46, %v2035_v5 }
 0x182   : > { %v2013_v48 = vpop.permute.xlu0 %630  ;;  %v2015_v49 = vpop.permute.xlu1 %621 }
 0x186   : > { %v595_v50 = vpop.permute.xlu0 %594  ;;  %v586_v51 = vpop.permute.xlu1 %585 }
 0x187   : > { %v696_v1 = vrot.slane %v586_v51, %v2032_v4  ;;  %v709_v51 = vrot.slane %v595_v50, %v2035_v5 }
 0x189   : > { %v701_v35 = vsel %vm673_vm1, %v700_v37, %v696_v1 }
 0x18a   : > { %v2017_v52 = vpop.permute.xlu0 %636  ;;  %v2019_v53 = vpop.permute.xlu1 %627 }
 0x18e   : > { %v601_v54 = vpop.permute.xlu0 %600  ;;  %v592_v55 = vpop.permute.xlu1 %591 }
 0x18f   : > { %v705_v63 = vrot.slane %v592_v55, %v2032_v4  ;;  %v674_v55 = vsel %vm673_vm1, %v672_v36, %v667_v43  ;;  %v718_v39 = vrot.slane %v601_v54, %v2035_v5  ;;  %v754_v36 = vrot.slane %v2009_v44, %v2035_v5 }
 0x190   : > { %v811_v46 = vsel %vm810_vm2, %v683_v45, %v674_v55  ;;  %v741_v54 = vrot.slane %v2011_v47, %v2032_v4  ;;  %v763_v47 = vrot.slane %v2013_v48, %v2035_v5 }
 0x191   : > { %v710_v6 = vsel %vm673_vm1, %v709_v51, %v705_v63  ;;  %v813_v37 = vsel %vm812_vm3, %v692_v41, %v811_v46 }
 0x192   : > { %v2021_v57 = vpop.permute.xlu0 %642  ;;  %v2023_v58 = vpop.permute.xlu1 %633  ;;  %v746_v51 = vsel %vm673_vm1, %v745_v9, %v741_v54 }
 0x193   : > { %v768_v44 = vrot.slane %v2023_v58, %v2032_v4  ;;  %v772_v58 = vrot.slane %v2017_v52, %v2035_v5 }
 0x196   : > { %v607_v60 = vpop.permute.xlu0 %606  ;;  %v598_v61 = vpop.permute.xlu1 %597 }
 0x197   : > { %v714_v0 = vrot.slane %v598_v61, %v2032_v4  ;;  %v750_v61 = vrot.slane %v2015_v49, %v2032_v4  ;;  %v727_v50 = vrot.slane %v607_v60, %v2035_v5  ;;  %v759_v49 = vrot.slane %v2019_v53, %v2032_v4 }
 0x199   : > { %v719_v1 = vsel %vm673_vm1, %v718_v39, %v714_v0  ;;  %v1545_v0 = vld [vmem:[%s2351_s3] ss:$0 sm:$0xff]  ;;  %v764_v55 = vsel %vm673_vm1, %v763_v47, %v759_v49 }
 0x19a   : > { %v2027_v2 = vpop.permute.xlu0 %648  ;;  %v2029_v3 = vpop.permute.xlu1 %639 }
 0x19b   : > { %v790_v52 = vrot.slane %v2027_v2, %v2035_v5  ;;  %v850_v2 = vsub.s32 1, %v2025_v62 }
 0x19e   : > { %v604_v56 = vpop.permute.xlu1 %603  ;;  %v613_v34 = vpop.permute.xlu0 %612 }
 0x19f   : > { %v723_v32 = vrot.slane %v604_v56, %v2032_v4  ;;  %v815_v56 = vsel %vm814_vm4, %v701_v35, %v813_v37  ;;  %v736_v43 = vrot.slane %v613_v34, %v2035_v5  ;;  %v755_v35 = vsel %vm673_vm1, %v754_v36, %v750_v61 }
 0x1a0   : > { %v817_v42 = vsel %vm816_vm5, %v710_v6, %v815_v56  ;;  %v773_v61 = vsel %vm673_vm1, %v772_v58, %v768_v44 }
 0x1a1   : > { %v728_v60 = vsel %vm673_vm1, %v727_v50, %v723_v32  ;;  %v819_v53 = vsel %vm818_vm6, %v719_v1, %v817_v42  ;;  %v777_v32 = vrot.slane %v2029_v3, %v2032_v4  ;;  %v781_v3 = vrot.slane %v2021_v57, %v2035_v5 }
 0x1a2   : > { %v646_v40 = vpop.permute.xlu1 %645  ;;  %v655_v59 = vpop.permute.xlu0 %654  ;;  %v821_v34 = vsel %vm820_vm7, %v728_v60, %v819_v53  ;;  %v824_v50 = vsel %vm810_vm2, %v755_v35, %v746_v51  ;;  %v861_v35 = vsub.s32 2, %v2025_v62 }
 0x1a3   : > { %v786_v41 = vrot.slane %v646_v40, %v2032_v4  ;;  %v782_v9 = vsel %vm673_vm1, %v781_v3, %v777_v32  ;;  %v799_v36 = vrot.slane %v655_v59, %v2035_v5  ;;  %v825_v57 = vsel %vm812_vm3, %v764_v55, %v824_v50 }
 0x1a4   : > { %v826_v56 = vsel %vm814_vm4, %v773_v61, %v825_v57 }
 0x1a5   : > { %v791_v1 = vsel %vm673_vm1, %v790_v52, %v786_v41  ;;  %v905_v52 = vsub.s32 6, %v2025_v62 }
 0x1a6   : > { %v610_v63 = vpop.permute.xlu1 %609  ;;  %v661_v37 = vpop.permute.xlu0 %660 }
 0x1a7   : > { %v732_v45 = vrot.slane %v610_v63, %v2032_v4  ;;  %v827_v63 = vsel %vm816_vm5, %v782_v9, %v826_v56  ;;  %v808_v59 = vrot.slane %v661_v37, %v2035_v5  ;;  %v916_v9 = vsub.s32 7, %v2025_v62 }
 0x1a8   : > { %v828_v44 = vsel %vm818_vm6, %v791_v1, %v827_v63 }
 0x1a9   : > { %v737_v48 = vsel %vm673_vm1, %v736_v43, %v732_v45 }
 0x1aa   : > { %v823_v39 = vsel %vm822_vm8, %v737_v48, %v821_v34  ;;  %v652_v46 = vpop.permute.xlu1 %651  ;;  %v872_v48 = vsub.s32 3, %v2025_v62 }
 0x1ab   : > { %v2099_v6 = vmul.f32 %v1545_v0, %v823_v39  ;;  %v795_v40 = vrot.slane %v652_v46, %v2032_v4  ;;  %v894_v39 = vsub.s32 5, %v2025_v62 }
 0x1ad   : > { %v840_v54 = vrot.slane %v2099_v6, %v839_v38  ;;  %v800_v49 = vsel %vm673_vm1, %v799_v36, %v795_v40  ;;  %v851_v47 = vrot.slane %v2099_v6, %v850_v2  ;;  %v862_v58 = vrot.slane %v2099_v6, %v861_v35 }
 0x1ae   : > { %v658_v60 = vpop.permute.xlu1 %657  ;;  %v829_v43 = vsel %vm820_vm7, %v800_v49, %v828_v44  ;;  %v873_v51 = vrot.slane %v2099_v6, %v872_v48  ;;  %v895_v46 = vrot.slane %v2099_v6, %v894_v39  ;;  %v906_v40 = vrot.slane %v2099_v6, %v905_v52 }
 0x1af   : > { %v804_v42 = vrot.slane %v658_v60, %v2032_v4  ;;  %846 = vbcast.lane.b32.xlu0 %v840_v54, 264  ;;  %842 = vbcast.lane.b32.xlu1 %v840_v54, 256  ;;  %v917_v36 = vrot.slane %v2099_v6, %v916_v9 }
 0x1b1   : > { %v809_v45 = vsel %vm673_vm1, %v808_v59, %v804_v42 }
 0x1b2   : > { %v830_v53 = vsel %vm822_vm8, %v809_v45, %v829_v43 }
 0x1b3   : > { %857 = vbcast.lane.b32.xlu0 %v851_v47, 264  ;;  %853 = vbcast.lane.b32.xlu1 %v851_v47, 256  ;;  %v834_v32 = vmul.f32 %v1545_v0, %v830_v53  ;;  %v883_v0 = vsub.s32 4, %v2025_v62 }
 0x1b5   : > { %v928_v34 = vrot.slane %v834_v32, %v839_v38  ;;  %v939_v41 = vrot.slane %v834_v32, %v850_v2  ;;  %v950_v55 = vrot.slane %v834_v32, %v861_v35  ;;  %v884_v3 = vrot.slane %v2099_v6, %v883_v0 }
 0x1b6   : > { %v961_v38 = vrot.slane %v834_v32, %v872_v48  ;;  %v972_v61 = vrot.slane %v834_v32, %v883_v0  ;;  %v983_v50 = vrot.slane %v834_v32, %v894_v39  ;;  %v994_v37 = vrot.slane %v834_v32, %v905_v52 }
 0x1b7   : > { %868 = vbcast.lane.b32.xlu0 %v862_v58, 264  ;;  %864 = vbcast.lane.b32.xlu1 %v862_v58, 256  ;;  %v1005_v57 = vrot.slane %v834_v32, %v916_v9 }
 0x1bb   : > { %934 = vbcast.lane.b32.xlu0 %v928_v34, 264  ;;  %930 = vbcast.lane.b32.xlu1 %v928_v34, 256 }
 0x1bf   : > { %945 = vbcast.lane.b32.xlu0 %v939_v41, 264  ;;  %941 = vbcast.lane.b32.xlu1 %v939_v41, 256 }
 0x1c3   : > { %879 = vbcast.lane.b32.xlu0 %v873_v51, 264  ;;  %875 = vbcast.lane.b32.xlu1 %v873_v51, 256 }
 0x1c7   : > { %956 = vbcast.lane.b32.xlu0 %v950_v55, 264  ;;  %952 = vbcast.lane.b32.xlu1 %v950_v55, 256 }
 0x1cb   : > { %890 = vbcast.lane.b32.xlu0 %v884_v3, 264  ;;  %886 = vbcast.lane.b32.xlu1 %v884_v3, 256 }
 0x1cf   : > { %967 = vbcast.lane.b32.xlu0 %v961_v38, 264  ;;  %963 = vbcast.lane.b32.xlu1 %v961_v38, 256 }
 0x1d3   : > { %901 = vbcast.lane.b32.xlu0 %v895_v46, 264  ;;  %897 = vbcast.lane.b32.xlu1 %v895_v46, 256 }
 0x1d7   : > { %978 = vbcast.lane.b32.xlu0 %v972_v61, 264  ;;  %974 = vbcast.lane.b32.xlu1 %v972_v61, 256 }
 0x1db   : > { %912 = vbcast.lane.b32.xlu0 %v906_v40, 264  ;;  %908 = vbcast.lane.b32.xlu1 %v906_v40, 256  ;;  %v2379_v40 = vld [vmem:[#allocation5_spill] sm:$0xff] }
 0x1df   : > { %989 = vbcast.lane.b32.xlu0 %v983_v50, 264  ;;  %985 = vbcast.lane.b32.xlu1 %v983_v50, 256 }
 0x1e3   : > { %923 = vbcast.lane.b32.xlu0 %v917_v36, 264  ;;  %919 = vbcast.lane.b32.xlu1 %v917_v36, 256 }
 0x1e7   : > { %1000 = vbcast.lane.b32.xlu0 %v994_v37, 264  ;;  %996 = vbcast.lane.b32.xlu1 %v994_v37, 256  ;;  %v2381_v37 = vld [vmem:[#allocation6_spill] sm:$0xff] }
 0x1eb   : > { %1011 = vbcast.lane.b32.xlu0 %v1005_v57, 264  ;;  %1007 = vbcast.lane.b32.xlu1 %v1005_v57, 256 }
 0x221   : > { %v847_v1 = vpop.permute.xlu0 %846  ;;  %v843_v54 = vpop.permute.xlu1 %842 }
 0x222   : > { %v1045_v62 = vsel %vm495_vm9, %v1896_v8, %v843_v54  ;;  %v1046_v2 = vsel %vm496_vm10, %v1902_v11, %v847_v1  ;;  %vm514_vm9 = vcmp.gt.f32.partialorder %v1912_v14, 0.0  ;;  %vm513_vm10 = vcmp.gt.f32.partialorder %v1929_v19, 0.0 }
 0x223   : > { %1122 = vperm.xlu0 %1617, %v1046_v2   ;;  %1119 = vperm.xlu1 %1616, %v1045_v62   ;;  %v2383_v2 = vld [vmem:[#allocation8_spill] sm:$0xff] }
 0x225   : > { %v858_v6 = vpop.permute.xlu0 %857  ;;  %v854_v56 = vpop.permute.xlu1 %853 }
 0x226   : > { %v1048_v49 = vsel %vm498_vm11, %v1908_v13, %v858_v6  ;;  %v1047_v60 = vsel %vm497_vm12, %v1893_v7, %v854_v56  ;;  %vm502_vm11 = vcmp.gt.f32.partialorder %v1919_v16, 0.0  ;;  %vm501_vm12 = vcmp.gt.f32.partialorder %v1936_v21, 0.0  ;;  %v2384_v56 = vld [vmem:[#allocation11_spill] sm:$0xff] }
 0x227   : > { %1128 = vperm.xlu0 %1617, %v1048_v49   ;;  %1125 = vperm.xlu1 %1616, %v1047_v60  }
 0x229   : > { %v869_v63 = vpop.permute.xlu0 %868  ;;  %v865_v8 = vpop.permute.xlu1 %864 }
 0x22a   : > { %v1050_v11 = vsel %vm500_vm13, %v1900_v10, %v869_v63  ;;  %v1049_v59 = vsel %vm499_vm14, %v1915_v15, %v865_v8  ;;  %vm516_vm13 = vcmp.gt.f32.partialorder %v1926_v18, 0.0  ;;  %vm515_vm14 = vcmp.gt.f32.partialorder %v1943_v23, 0.0  ;;  %v1077_v8 = vld [vmem:[%s2352_s4] sm:$0xff] }
 0x22b   : > { %1134 = vperm.xlu0 %1617, %v1050_v11   ;;  %1131 = vperm.xlu1 %1616, %v1049_v59   ;;  %v1078_v11 = vld [vmem:[%s2352_s4 + $0x8] sm:$0xff] }
 0x22c   : > { %v1571_v59 = vpack.c.bf16 %v1078_v11, %v1077_v8 }
 0x22d   : > { %v935_v42 = vpop.permute.xlu0 %934  ;;  %v931_v7 = vpop.permute.xlu1 %930 }
 0x22e   : > { %v1062_v13 = vsel %vm512_vm15, %v1906_v12, %v935_v42  ;;  %v1061_v44 = vsel %vm511_vm0, %v1922_v17, %v931_v7  ;;  %vm504_vm15 = vcmp.gt.f32.partialorder %v1933_v20, 0.0  ;;  %vm503_vm0 = vcmp.gt.f32.partialorder %v1950_v25, 0.0  ;;  %1572 = vmatprep.subr.bf16.mxu0 %v1571_v59 }
 0x22f   : > { %1170 = vperm.xlu0 %1617, %v1062_v13   ;;  %1167 = vperm.xlu1 %1616, %v1061_v44  }
 0x230   : > { %1574 = vmatpush3.bf16.msra.mxu0 %v1571_v59 }
 0x231   : > { %v946_v43 = vpop.permute.xlu0 %945  ;;  %v942_v10 = vpop.permute.xlu1 %941 }
 0x232   : > { %v1064_v15 = vsel %vm514_vm9, %v1912_v14, %v946_v43  ;;  %v1063_v45 = vsel %vm513_vm10, %v1929_v19, %v942_v10  ;;  %vm518_vm9 = vcmp.gt.f32.partialorder %v1940_v22, 0.0  ;;  %vm517_vm10 = vcmp.gt.f32.partialorder %v1957_v27, 0.0 }
 0x233   : > { %1176 = vperm.xlu0 %1617, %v1064_v15   ;;  %1173 = vperm.xlu1 %1616, %v1063_v45  }
 0x235   : > { %v880_v47 = vpop.permute.xlu0 %879  ;;  %v876_v12 = vpop.permute.xlu1 %875 }
 0x236   : > { %v1052_v17 = vsel %vm502_vm11, %v1919_v16, %v880_v47  ;;  %v1051_v35 = vsel %vm501_vm12, %v1936_v21, %v876_v12  ;;  %vm506_vm11 = vcmp.gt.f32.partialorder %v1947_v24, 0.0  ;;  %vm505_vm12 = vcmp.gt.f32.partialorder %v1964_v29, 0.0 }
 0x237   : > { %1140 = vperm.xlu0 %1617, %v1052_v17   ;;  %1137 = vperm.xlu1 %1616, %v1051_v35  }
 0x239   : > { %v957_v53 = vpop.permute.xlu0 %956  ;;  %v953_v14 = vpop.permute.xlu1 %952 }
 0x23a   : > { %v1066_v19 = vsel %vm516_vm13, %v1926_v18, %v957_v53  ;;  %v1065_v32 = vsel %vm515_vm14, %v1943_v23, %v953_v14  ;;  %vm520_vm13 = vcmp.gt.f32.partialorder %v1954_v26, 0.0  ;;  %vm519_vm14 = vcmp.gt.f32.partialorder %v1971_v31, 0.0 }
 0x23b   : > { %1182 = vperm.xlu0 %1617, %v1066_v19   ;;  %1179 = vperm.xlu1 %1616, %v1065_v32  }
 0x23d   : > { %v891_v58 = vpop.permute.xlu0 %890  ;;  %v887_v16 = vpop.permute.xlu1 %886 }
 0x23e   : > { %v1054_v21 = vsel %vm504_vm15, %v1933_v20, %v891_v58  ;;  %v1053_v34 = vsel %vm503_vm0, %v1950_v25, %v887_v16  ;;  %vm508_vm15 = vcmp.gt.f32.partialorder %v1961_v28, 0.0  ;;  %vm507_vm0 = vcmp.gt.f32.partialorder %v1978_v33, 0.0 }
 0x23f   : > { %1146 = vperm.xlu0 %1617, %v1054_v21   ;;  %1143 = vperm.xlu1 %1616, %v1053_v34  }
 0x241   : > { %v968_v41 = vpop.permute.xlu0 %967  ;;  %v964_v18 = vpop.permute.xlu1 %963 }
 0x242   : > { %v1068_v23 = vsel %vm518_vm9, %v1940_v22, %v968_v41  ;;  %v1067_v48 = vsel %vm517_vm10, %v1957_v27, %v964_v18  ;;  %vm522_vm9 = vcmp.gt.f32.partialorder %v1968_v30, 0.0 }
 0x243   : > { %1188 = vperm.xlu0 %1617, %v1068_v23   ;;  %1185 = vperm.xlu1 %1616, %v1067_v48  }
 0x245   : > { %v902_v51 = vpop.permute.xlu0 %901  ;;  %v898_v20 = vpop.permute.xlu1 %897 }
 0x246   : > { %v1056_v25 = vsel %vm506_vm11, %v1947_v24, %v902_v51  ;;  %v1055_v55 = vsel %vm505_vm12, %v1964_v29, %v898_v20  ;;  %vm510_vm11 = vcmp.gt.f32.partialorder %v2379_v40, 0.0 }
 0x247   : > { %1152 = vperm.xlu0 %1617, %v1056_v25   ;;  %1149 = vperm.xlu1 %1616, %v1055_v55  }
 0x249   : > { %v979_v0 = vpop.permute.xlu0 %978  ;;  %v975_v22 = vpop.permute.xlu1 %974 }
 0x24a   : > { %v1070_v27 = vsel %vm520_vm13, %v1954_v26, %v979_v0  ;;  %v1069_v3 = vsel %vm519_vm14, %v1971_v31, %v975_v22  ;;  %v2378_v26 = vld [vmem:[#allocation7_spill] sm:$0xff]  ;;  %vm524_vm13 = vcmp.gt.f32.partialorder %v2381_v37, 0.0 }
 0x24b   : > { %1194 = vperm.xlu0 %1617, %v1070_v27   ;;  %1191 = vperm.xlu1 %1616, %v1069_v3   ;;  %vm521_vm10 = vcmp.gt.f32.partialorder %v2378_v26, 0.0 }
 0x24d   : > { %v913_v38 = vpop.permute.xlu0 %912  ;;  %v909_v24 = vpop.permute.xlu1 %908 }
 0x24e   : > { %v1058_v29 = vsel %vm508_vm15, %v1961_v28, %v913_v38  ;;  %v1057_v39 = vsel %vm507_vm0, %v1978_v33, %v909_v24  ;;  %v2380_v28 = vld [vmem:[#allocation9_spill] sm:$0xff]  ;;  %vm526_vm15 = vcmp.gt.f32.partialorder %v2383_v2, 0.0  ;;  %vm525_vm0 = vcmp.gt.f32.partialorder %v2384_v56, 0.0 }
 0x24f   : > { %1158 = vperm.xlu0 %1617, %v1058_v29   ;;  %1155 = vperm.xlu1 %1616, %v1057_v39   ;;  %vm509_vm12 = vcmp.gt.f32.partialorder %v2380_v28, 0.0 }
 0x251   : > { %v990_v46 = vpop.permute.xlu0 %989  ;;  %v986_v31 = vpop.permute.xlu1 %985 }
 0x252   : > { %v1072_v61 = vsel %vm522_vm9, %v1968_v30, %v990_v46  ;;  %v1071_v52 = vsel %vm521_vm10, %v2378_v26, %v986_v31  ;;  %v2382_v30 = vld [vmem:[#allocation10_spill] sm:$0xff]  ;;  %vm1372_vm9 = vcmask 130048  }
 0x253   : > { %1200 = vperm.xlu0 %1617, %v1072_v61   ;;  %1197 = vperm.xlu1 %1616, %v1071_v52   ;;  %vm523_vm14 = vcmp.gt.f32.partialorder %v2382_v30, 0.0 }
 0x255   : > { %v924_v50 = vpop.permute.xlu0 %923  ;;  %v920_v33 = vpop.permute.xlu1 %919 }
 0x256   : > { %v1060_v9 = vsel %vm510_vm11, %v2379_v40, %v924_v50  ;;  %v1059_v36 = vsel %vm509_vm12, %v2380_v28, %v920_v33 }
 0x257   : > { %1164 = vperm.xlu0 %1617, %v1060_v9   ;;  %1161 = vperm.xlu1 %1616, %v1059_v36  }
 0x259   : > { %v1001_v57 = vpop.permute.xlu0 %1000  ;;  %v997_v1 = vpop.permute.xlu1 %996 }
 0x25a   : > { %v1074_v54 = vsel %vm524_vm13, %v2381_v37, %v1001_v57  ;;  %v1073_v62 = vsel %vm523_vm14, %v2382_v30, %v997_v1 }
 0x25b   : > { %1206 = vperm.xlu0 %1617, %v1074_v54   ;;  %1203 = vperm.xlu1 %1616, %v1073_v62  }
 0x25d   : > { %v1012_v6 = vpop.permute.xlu0 %1011  ;;  %v1008_v49 = vpop.permute.xlu1 %1007 }
 0x25e   : > { %v1076_v60 = vsel %vm526_vm15, %v2383_v2, %v1012_v6  ;;  %v1075_v63 = vsel %vm525_vm0, %v2384_v56, %v1008_v49 }
 0x25f   : > { %1212 = vperm.xlu0 %1617, %v1076_v60   ;;  %1209 = vperm.xlu1 %1616, %v1075_v63  }
 0x2a2   : > { %v1123_v42 = vpop.permute.xlu0 %1122  ;;  %v1120_v7 = vpop.permute.xlu1 %1119 }
 0x2a3   : > { %v1221_v25 = vrot.slane %v1123_v42, %v2035_v5  ;;  %v1217_v55 = vrot.slane %v1120_v7, %v2032_v4 }
 0x2a5   : > { %v1222_v31 = vsel %vm673_vm1, %v1221_v25, %v1217_v55 }
 0x2a6   : > { %v1129_v13 = vpop.permute.xlu0 %1128  ;;  %v1126_v44 = vpop.permute.xlu1 %1125 }
 0x2a7   : > { %v1230_v23 = vrot.slane %v1129_v13, %v2035_v5  ;;  %v1226_v48 = vrot.slane %v1126_v44, %v2032_v4 }
 0x2a9   : > { %v1231_v29 = vsel %vm673_vm1, %v1230_v23, %v1226_v48 }
 0x2aa   : > { %v1135_v43 = vpop.permute.xlu0 %1134  ;;  %v1132_v10 = vpop.permute.xlu1 %1131  ;;  %v1358_v33 = vsel %vm810_vm2, %v1231_v29, %v1222_v31 }
 0x2ab   : > { %v1239_v51 = vrot.slane %v1135_v43, %v2035_v5  ;;  %v1235_v20 = vrot.slane %v1132_v10, %v2032_v4 }
 0x2ad   : > { %v1240_v39 = vsel %vm673_vm1, %v1239_v51, %v1235_v20 }
 0x2ae   : > { %v2205_v15 = vpop.permute.xlu0 %1170  ;;  %v2207_v45 = vpop.permute.xlu1 %1167  ;;  %v1359_v36 = vsel %vm812_vm3, %v1240_v39, %v1358_v33 }
 0x2af   : > { %v1293_v30 = vrot.slane %v2205_v15, %v2035_v5  ;;  %v1289_v1 = vrot.slane %v2207_v45, %v2032_v4 }
 0x2b2   : > { %v1177_v47 = vpop.permute.xlu0 %1176  ;;  %v1174_v12 = vpop.permute.xlu1 %1173 }
 0x2b3   : > { %v1302_v37 = vrot.slane %v1177_v47, %v2035_v5  ;;  %v1298_v57 = vrot.slane %v1174_v12, %v2032_v4 }
 0x2b5   : > { %v1303_v7 = vsel %vm673_vm1, %v1302_v37, %v1298_v57 }
 0x2b6   : > { %v1141_v17 = vpop.permute.xlu0 %1140  ;;  %v1138_v35 = vpop.permute.xlu1 %1137 }
 0x2b7   : > { %v1248_v0 = vrot.slane %v1141_v17, %v2035_v5  ;;  %v1244_v22 = vrot.slane %v1138_v35, %v2032_v4 }
 0x2b9   : > { %v1249_v61 = vsel %vm673_vm1, %v1248_v0, %v1244_v22 }
 0x2ba   : > { %v1183_v53 = vpop.permute.xlu0 %1182  ;;  %v1180_v14 = vpop.permute.xlu1 %1179  ;;  %v1360_v54 = vsel %vm814_vm4, %v1249_v61, %v1359_v36 }
 0x2bb   : > { %v1311_v2 = vrot.slane %v1183_v53, %v2035_v5  ;;  %v1307_v6 = vrot.slane %v1180_v14, %v2032_v4  ;;  %v1294_v14 = vsel %vm673_vm1, %v1293_v30, %v1289_v1 }
 0x2bd   : > { %v1312_v12 = vsel %vm673_vm1, %v1311_v2, %v1307_v6 }
 0x2be   : > { %v1147_v19 = vpop.permute.xlu0 %1146  ;;  %v1144_v32 = vpop.permute.xlu1 %1143 }
 0x2bf   : > { %v1257_v38 = vrot.slane %v1147_v19, %v2035_v5  ;;  %v1253_v24 = vrot.slane %v1144_v32, %v2032_v4 }
 0x2c1   : > { %v1258_v9 = vsel %vm673_vm1, %v1257_v38, %v1253_v24  ;;  %v1546_v38 = vld [vmem:[%s2353_s5] ss:$0 sm:$0xff] }
 0x2c2   : > { %v2209_v58 = vpop.permute.xlu0 %1188  ;;  %v1186_v16 = vpop.permute.xlu1 %1185  ;;  %v1361_v63 = vsel %vm816_vm5, %v1258_v9, %v1360_v54 }
 0x2c3   : > { %v1320_v8 = vrot.slane %v2209_v58, %v2035_v5  ;;  %v1316_v11 = vrot.slane %v1186_v16, %v2032_v4  ;;  %v1365_v16 = vsel %vm810_vm2, %v1303_v7, %v1294_v14 }
 0x2c5   : > { %v1321_v19 = vsel %vm673_vm1, %v1320_v8, %v1316_v11 }
 0x2c6   : > { %v1153_v21 = vpop.permute.xlu0 %1152  ;;  %v1150_v34 = vpop.permute.xlu1 %1149 }
 0x2c7   : > { %v1266_v46 = vrot.slane %v1153_v21, %v2035_v5  ;;  %v1262_v26 = vrot.slane %v1150_v34, %v2032_v4  ;;  %v1366_v34 = vsel %vm812_vm3, %v1312_v12, %v1365_v16 }
 0x2c9   : > { %v1267_v62 = vsel %vm673_vm1, %v1266_v46, %v1262_v26 }
 0x2ca   : > { %v2211_v41 = vpop.permute.xlu0 %1194  ;;  %v2213_v18 = vpop.permute.xlu1 %1191  ;;  %v1362_v43 = vsel %vm818_vm6, %v1267_v62, %v1361_v63 }
 0x2cb   : > { %v1329_v13 = vrot.slane %v2211_v41, %v2035_v5  ;;  %v1325_v44 = vrot.slane %v2213_v18, %v2032_v4  ;;  %v1367_v18 = vsel %vm814_vm4, %v1321_v19, %v1366_v34 }
 0x2cd   : > { %v1330_v21 = vsel %vm673_vm1, %v1329_v13, %v1325_v44 }
 0x2ce   : > { %v1159_v27 = vpop.permute.xlu0 %1158  ;;  %v1156_v3 = vpop.permute.xlu1 %1155  ;;  %v1368_v20 = vsel %vm816_vm5, %v1330_v21, %v1367_v18 }
 0x2cf   : > { %v1275_v52 = vrot.slane %v1159_v27, %v2035_v5  ;;  %v1271_v40 = vrot.slane %v1156_v3, %v2032_v4 }
 0x2d1   : > { %v1276_v60 = vsel %vm673_vm1, %v1275_v52, %v1271_v40 }
 0x2d2   : > { %v1201_v50 = vpop.permute.xlu0 %1200  ;;  %v1198_v28 = vpop.permute.xlu1 %1197  ;;  %v1363_v47 = vsel %vm820_vm7, %v1276_v60, %v1362_v43 }
 0x2d3   : > { %v1338_v10 = vrot.slane %v1201_v50, %v2035_v5  ;;  %v1334_v15 = vrot.slane %v1198_v28, %v2032_v4 }
 0x2d5   : > { %v1339_v41 = vsel %vm673_vm1, %v1338_v10, %v1334_v15 }
 0x2d6   : > { %v1165_v56 = vpop.permute.xlu0 %1164  ;;  %v1162_v49 = vpop.permute.xlu1 %1161  ;;  %v1369_v0 = vsel %vm818_vm6, %v1339_v41, %v1368_v20 }
 0x2d7   : > { %v1284_v59 = vrot.slane %v1165_v56, %v2035_v5  ;;  %v1280_v42 = vrot.slane %v1162_v49, %v2032_v4 }
 0x2d9   : > { %v1285_v45 = vsel %vm673_vm1, %v1284_v59, %v1280_v42 }
 0x2da   : > { %v1207_v17 = vpop.permute.xlu0 %1206  ;;  %v1204_v35 = vpop.permute.xlu1 %1203  ;;  %v1364_v53 = vsel %vm822_vm8, %v1285_v45, %v1363_v47 }
 0x2db   : > { %v1347_v32 = vrot.slane %v1207_v17, %v2035_v5  ;;  %v1343_v58 = vrot.slane %v1204_v35, %v2032_v4  ;;  %1568 = vmatprep.mubr.msk.f32.mxu0 %vm1372_vm9, %v1364_v53 }
 0x2dd   : > { %v1348_v23 = vsel %vm673_vm1, %v1347_v32, %v1343_v58 }
 0x2de   : > { %v1213_v48 = vpop.permute.xlu0 %1212  ;;  %v1210_v51 = vpop.permute.xlu1 %1209  ;;  %v1370_v27 = vsel %vm820_vm7, %v1348_v23, %v1369_v0 }
 0x2df   : > { %v1356_v25 = vrot.slane %v1213_v48, %v2035_v5  ;;  %v1352_v55 = vrot.slane %v1210_v51, %v2032_v4 }
 0x2e1   : > { %v1357_v22 = vsel %vm673_vm1, %v1356_v25, %v1352_v55 }
 0x2e2   : > { %v1371_v3 = vsel %vm822_vm8, %v1357_v22, %v1370_v27 }
 0x2e3   : > { %1569 = vmatmul.mubr.msk.f32.vlgmr.msra.gmra.mrb[0].mxu0 %vm1372_vm9, %v1371_v3 }
 0x3b4   : > { %1461 = sbr.rel (!%p1759_p5) target bundleno = 983 (0x3d7), region = 48 }
 0x3b6   : > { %v1570_v24 = vpop.f32.mrb[0].mxu0 }
 0x3b7   : > { %v1449_v5 = vadd.f32 %v1570_v24, %v1546_v38  ;;  %v1443_v29 = vpop.f32.mrb[1].mxu0 }
 0x3b8   : > { %v1444_v4 = vadd.f32 %v1546_v38, %v1443_v29 }
 0x3b9   : > { %1453 = vst [vmem:[%s262_s15 + $0x8] sm:$0xff] %v1449_v5 }
 0x3ba   : > { %1452 = vst [vmem:[%s262_s15] sm:$0xff] %v1444_v4 }
 0x3bb   : > { %s2392_s18 = smov (!%p1464_p11, %s1463_s18), 2 }
 0x3bc   : > { %s2293_s19 = sshll.u32 %s2392_s18, 7 }
 0x3bd   : > { %s1468_s20 = ssub.s32 256, %s2293_s19 }
 0x3be   : > { %1469 = vsyncadd %s2288_s16, %s1468_s20  ;;  %p1552_p12 = scmp.ne.s32.totalorder %s2293_s19, 0  ;;  %s1559_s26 = sshll.u32 %s1742_s25, 8 }
 0x3bf   : > { %s2302_s29 = scalar_lea.hbm %s2354_s6, %s1559_s26  ;;  %s1474_s9 = sshll.u32 %s262_s15, 4  ;;  %s2304_s9 = int_to_ptr.vmem [resolvable:$true] %s1474_s9 }
 0x3c0   : > { %s1618_s10 = scalar_lea.vmem %s2304_s9, %s2293_s19  ;;  %s1683_s11 = smov [#allocation2]  }
 0x3c1   : > { %p1619_p13 = scmp.ne.s32.totalorder %s2304_s9, %s1618_s10  ;;  %s1622_s12 = sshll.u32 %s1683_s11, 4  ;;  %s1623_s12 = int_to_ptr.vmem [resolvable:$false] %s1622_s12 }
 0x3c2   : > { %s1624_s25 = scalar_lea.vmem %s1623_s12, 512  ;;  %p1625_p2 = scmp.lt.s32.totalorder %s2304_s9, %s1623_s12 }
 0x3c3   : > { %p1620_p0 = pnand %p1619_p13, %p1552_p12  ;;  %p1626_p3 = scmp.lt.s32.totalorder %s1624_s25, %s1618_s10 }
 0x3c5   : > { %p1621_p1 = pneg %p1620_p0  ;;  %p1627_p4 = por %p1626_p3, %p1625_p2 }
 0x3c7   : > { %p1628_p5 = pnand %p1627_p4, %p1621_p1 }
 0x3c9   : > { %1631 = shalt.err (!%p1628_p5)
}
 0x3ca   : > { %s1632_s13 = scalar_lea.hbm %s2302_s29, %s2293_s19  ;;  %s1636_s17 = scalar_lea.hbm %s2354_s6, 384 }
 0x3cb   : > { %p1633_p7 = scmp.ne.s32.totalorder %s2302_s29, %s1632_s13  ;;  %p1637_p10 = scmp.lt.u32.totalorder %s2302_s29, %s2354_s6 }
 0x3cc   : > { %p1638_p11 = scmp.lt.u32.totalorder %s1636_s17, %s1632_s13  ;;  %p1640_p0 = scmp.lt.u32.totalorder %s1632_s13, %s2302_s29 }
 0x3cd   : > { %p1634_p8 = pnand %p1633_p7, %p1552_p12 }
 0x3ce   : > { %p1639_p13 = por %p1638_p11, %p1637_p10 }
 0x3cf   : > { %p1635_p9 = pneg %p1634_p8 }
 0x3d0   : > { %p1641_p1 = por %p1640_p0, %p1639_p13 }
 0x3d2   : > { %p1642_p2 = pnand %p1641_p1, %p1635_p9 }
 0x3d4   : > { %1645 = shalt.err (!%p1642_p2)
}
 0x3d5   : > { %s1684_s26 = smov 128   ;;  %s1685_s28 = smov 8  }
 0x3d6   : > { %1480 = dma.vmem_to_hbm [thread:$0]  (%p1552_p12), %s2304_s9, %s2293_s19, %s2302_s29, %s2288_s16, %s1684_s26, %s1684_s26, %s1685_s28  }
 0x3d7 PF: > { %p1580_p3 = scmp.ge.s32.totalorder %s1680_s24, 2  ;;  %s1489_s7 = sand.u32 1, %s1668_s21  }
 0x3d8   : > { %s1490_s10 = scalar_lea.sflag [#allocation3], %s1489_s7 }
 0x3d9   : > { %p1577_p4 = pnand %p1580_p3, %p1763_p6 }
 0x3db   : > { %1663 = dma.done.wait (!%p1577_p4), %s1490_s10, 256  }
 0x3dc   : > { %1665 = vsyncadd (!%p1577_p4), %s1490_s10, 4294967040  ;;  %p16_p5 = scmp.ge.s32.totalorder %s1746_s27, 4   ;;  %s2385_s21 = smov %s1672_s22 }
 0x3dd   : > { %s2386_s22 = smov %s1676_s23  ;;  %s2387_s23 = smov %s1757_s30 }
 0x3de   : > { %s2388_s24 = smov %s1746_s27  ;;  %18 = sbr.rel (!%p16_p5) target bundleno = 3 (0x3), region = 79 }
 0x3e5   :  { %1495 = vsyncpa [#allocation3], 1 }
 0x3e6   :  { %1497 = vsyncpa [#allocation3 + $0x1], 1 }

</bundles_post_ra>
